<compile_context>
chip_gen: v7x
topology: tpu7x:2x2x1
jax: 0.10.0
libtpu: 0.0.40
codegen_flags: <defaults>
</compile_context>

<pallas_src>
import functools

import jax
import jax.numpy as jnp
from jax.experimental import pallas as pl
from jax.experimental.pallas import tpu as pltpu

_LANES = 128
_DEFAULT_TILE_B = 512     # rows per batch tile (multiple of 8)
_DEFAULT_TILE_C = 2048    # classes per class tile (multiple of 128)
_VMEM_LIMIT = 32 * 1024 * 1024


# ---------------------------------------------------------------------------
# Kernels
# ---------------------------------------------------------------------------
def _ce_hard_kernel(B, C, y_ref, t_ref, out_ref, m_sc, s_sc, d_sc):
    """Online LSE cross-entropy with integer targets; fused target gather."""
    i = pl.program_id(0)
    k = pl.program_id(1)
    nk = pl.num_programs(1)
    TB, TC = y_ref.shape

    @pl.when(k == 0)
    def _():
        m_sc[...] = jnp.full_like(m_sc, -jnp.inf)
        s_sc[...] = jnp.zeros_like(s_sc)
        d_sc[...] = jnp.zeros_like(d_sc)

    col = jax.lax.broadcasted_iota(jnp.int32, (TB, TC), 1) + k * TC
    col_ok = col < C                                       # mask padded lanes
    lf_raw = y_ref[...].astype(jnp.float32)
    lf = jnp.where(col_ok, lf_raw, -jnp.inf)
    tgt = t_ref[...]                                       # [TB, 1] int32

    m_tile = jnp.max(lf, axis=-1, keepdims=True)
    m_new = jnp.maximum(m_sc[...], m_tile)
    # rescale running sum-exp and add this tile's contribution (same sweep
    # also accumulates the target logit -> no second pass over the tile).
    s_sc[...] = s_sc[...] * jnp.exp(m_sc[...] - m_new) + jnp.sum(
        jnp.exp(lf - m_new), axis=-1, keepdims=True)
    d_sc[...] = d_sc[...] + jnp.sum(jnp.where(col == tgt, lf, 0.0),
                                    axis=-1, keepdims=True)
    m_sc[...] = m_new

    @pl.when(k == nk - 1)
    def _():
        row = jax.lax.broadcasted_iota(jnp.int32, (TB, 1), 0) + i * TB
        nll = m_sc[...] + jnp.log(s_sc[...]) - d_sc[...]
        nll = jnp.where(row < B, nll, 0.0)                 # mask padded rows
        part = jnp.sum(nll)
        out_ref[...] = jnp.broadcast_to(part.reshape(1, 1, 1), (1, 8, _LANES))


def _ce_soft_kernel(B, C, y_ref, p_ref, out_ref, m_sc, s_sc, d_sc, w_sc):
    """Online LSE cross-entropy with probability (soft) targets."""
    i = pl.program_id(0)
    k = pl.program_id(1)
    nk = pl.num_programs(1)
    TB, TC = y_ref.shape

    @pl.when(k == 0)
    def _():
        m_sc[...] = jnp.full_like(m_sc, -jnp.inf)
        s_sc[...] = jnp.zeros_like(s_sc)
        d_sc[...] = jnp.zeros_like(d_sc)
        w_sc[...] = jnp.zeros_like(w_sc)

    col = jax.lax.broadcasted_iota(jnp.int32, (TB, TC), 1) + k * TC
    col_ok = col < C
    lf_raw = y_ref[...].astype(jnp.float32)
    lf_inf = jnp.where(col_ok, lf_raw, -jnp.inf)
    lf0 = jnp.where(col_ok, lf_raw, 0.0)
    p0 = jnp.where(col_ok, p_ref[...].astype(jnp.float32), 0.0)

    m_tile = jnp.max(lf_inf, axis=-1, keepdims=True)
    m_new = jnp.maximum(m_sc[...], m_tile)
    s_sc[...] = s_sc[...] * jnp.exp(m_sc[...] - m_new) + jnp.sum(
        jnp.exp(lf_inf - m_new), axis=-1, keepdims=True)
    d_sc[...] = d_sc[...] + jnp.sum(p0 * lf0, axis=-1, keepdims=True)
    w_sc[...] = w_sc[...] + jnp.sum(p0, axis=-1, keepdims=True)
    m_sc[...] = m_new

    @pl.when(k == nk - 1)
    def _():
        row = jax.lax.broadcasted_iota(jnp.int32, (TB, 1), 0) + i * TB
        lse = m_sc[...] + jnp.log(s_sc[...])
        loss = w_sc[...] * lse - d_sc[...]
        loss = jnp.where(row < B, loss, 0.0)
        part = jnp.sum(loss)
        out_ref[...] = jnp.broadcast_to(part.reshape(1, 1, 1), (1, 8, _LANES))


def _err_kernel(B, C, y_ref, t_ref, out_ref, m_sc, p_sc):
    """Online first-max argmax -> per-tile correct-count partial."""
    i = pl.program_id(0)
    k = pl.program_id(1)
    nk = pl.num_programs(1)
    TB, TC = y_ref.shape

    @pl.when(k == 0)
    def _():
        m_sc[...] = jnp.full_like(m_sc, -jnp.inf)
        p_sc[...] = jnp.full_like(p_sc, C)

    col = jax.lax.broadcasted_iota(jnp.int32, (TB, TC), 1) + k * TC
    col_ok = col < C
    x = y_ref[...]                               # compare in the input dtype
    if not jnp.issubdtype(x.dtype, jnp.floating):
        x = x.astype(jnp.float32)
    xm = jnp.where(col_ok, x, -jnp.inf)

    m_tile = jnp.max(xm, axis=-1, keepdims=True)
    # first index achieving the tile max (torch.max dim=-1 tie-break)
    p_tile = jnp.min(jnp.where((xm == m_tile) & col_ok, col, C),
                     axis=-1, keepdims=True)
    m_tile_f = m_tile.astype(jnp.float32)
    take = m_tile_f > m_sc[...]                  # strict > keeps earliest max
    p_sc[...] = jnp.where(take, p_tile, p_sc[...])
    m_sc[...] = jnp.maximum(m_sc[...], m_tile_f)

    @pl.when(k == nk - 1)
    def _():
        tgt = t_ref[...]
        row = jax.lax.broadcasted_iota(jnp.int32, (TB, 1), 0) + i * TB
        correct = jnp.where((row < B) & (p_sc[...] == tgt), 1.0, 0.0)
        part = jnp.sum(correct)
        out_ref[...] = jnp.broadcast_to(part.reshape(1, 1, 1), (1, 8, _LANES))


# ---------------------------------------------------------------------------
# Launchers
# ---------------------------------------------------------------------------
def _tile_sizes(Bf, C, tile_b, tile_c):
    tb = Bf if Bf <= tile_b else max(8, (tile_b // 8) * 8)
    tc = C if C <= tile_c else max(_LANES, (tile_c // _LANES) * _LANES)
    return tb, tc


def _compiler_params():
    return pltpu.CompilerParams(
        dimension_semantics=("parallel", "arbitrary"),
        vmem_limit_bytes=_VMEM_LIMIT)


def _launch(kernel, y2d, t_arr, t_spec, scratch, tb, tc, nb, nc):
    Bf, C = y2d.shape
    out = pl.pallas_call(
        functools.partial(kernel, Bf, C),
        out_shape=jax.ShapeDtypeStruct((nb, 8, _LANES), jnp.float32),
        grid_spec=pltpu.PrefetchScalarGridSpec(
            num_scalar_prefetch=0,
            grid=(nb, nc),
            in_specs=[pl.BlockSpec((tb, tc), lambda i, k: (i, k)), t_spec],
            out_specs=pl.BlockSpec((1, 8, _LANES), lambda i, k: (i, 0, 0)),
            scratch_shapes=scratch),
        compiler_params=_compiler_params(),
    )(y2d, t_arr)
    return jnp.sum(out[:, 0, 0])


def cat_cross_entropy(y, targets, *, tile_b=_DEFAULT_TILE_B,
                      tile_c=_DEFAULT_TILE_C):
    C = y.shape[-1]
    y2 = y.reshape(-1, C)
    Bf = y2.shape[0]
    t2 = targets.reshape(Bf, 1).astype(jnp.int32)
    tb, tc = _tile_sizes(Bf, C, tile_b, tile_c)
    nb, nc = pl.cdiv(Bf, tb), pl.cdiv(C, tc)
    t_spec = pl.BlockSpec((tb, 1), lambda i, k: (i, 0))
    scratch = [pltpu.VMEM((tb, 1), jnp.float32)] * 3
    total = _launch(_ce_hard_kernel, y2, t2, t_spec, scratch, tb, tc, nb, nc)
    return total / jnp.float32(Bf)


def cat_soft_cross_entropy(y, probs, *, tile_b=_DEFAULT_TILE_B,
                           tile_c=_DEFAULT_TILE_C):
    C = y.shape[-1]
    y2 = y.reshape(-1, C)
    p2 = probs.reshape(-1, C)
    Bf = y2.shape[0]
    tb, tc = _tile_sizes(Bf, C, tile_b, tile_c)
    nb, nc = pl.cdiv(Bf, tb), pl.cdiv(C, tc)
    t_spec = pl.BlockSpec((tb, tc), lambda i, k: (i, k))
    scratch = [pltpu.VMEM((tb, 1), jnp.float32)] * 4
    total = _launch(_ce_soft_kernel, y2, p2, t_spec, scratch, tb, tc, nb, nc)
    return total / jnp.float32(Bf)


def cat_error_rate(y, targets, *, tile_b=_DEFAULT_TILE_B,
                   tile_c=_DEFAULT_TILE_C):
    C = y.shape[-1]
    y2 = y.reshape(-1, C)
    Bf = y2.shape[0]
    t2 = targets.reshape(Bf, 1).astype(jnp.int32)
    tb, tc = _tile_sizes(Bf, C, tile_b, tile_c)
    nb, nc = pl.cdiv(Bf, tb), pl.cdiv(C, tc)
    t_spec = pl.BlockSpec((tb, 1), lambda i, k: (i, 0))
    scratch = [pltpu.VMEM((tb, 1), jnp.float32),
               pltpu.VMEM((tb, 1), jnp.int32)]
    correct = _launch(_err_kernel, y2, t2, t_spec, scratch, tb, tc, nb, nc)
    return 1.0 - correct / jnp.float32(Bf)


class CatLoss:
    """JAX/Pallas port of mlmisc.loss_wrappers.CatLoss.

    The wrapped `loss` is a Pallas categorical cross-entropy kernel;
    `training` mirrors the `self.loss.training` flag used by the PyTorch
    forward.
    """

    def __init__(self, training=True, tile_b=_DEFAULT_TILE_B,
                 tile_c=_DEFAULT_TILE_C):
        self.training = training
        self.tile_b = tile_b
        self.tile_c = tile_c

    def __call__(self, y, targets):
        if targets is None:
            return None
        # TODO(synk): dispatch very small (B*C) problems to plain XLA; fixed
        # pallas_call overhead dominates below a few tens of KiB.
        y = jnp.asarray(y)
        targets = jnp.asarray(targets)
        kw = dict(tile_b=self.tile_b, tile_c=self.tile_c)
        targets_is_integer = jnp.issubdtype(targets.dtype, jnp.integer)
        if self.training or not targets_is_integer:
            if targets_is_integer:
                return cat_cross_entropy(y, targets, **kw)
            if targets.shape == y.shape:
                return cat_soft_cross_entropy(y, targets, **kw)
            # TODO(synk): other wrapped-loss target layouts (e.g. float class
            # indices) have no built-in categorical kernel here.
            raise NotImplementedError("unsupported float target layout")
        return cat_error_rate(y, targets, **kw)


# ---------------------------------------------------------------------------
# Self-test
# ---------------------------------------------------------------------------
def _ref_hard_ce(y, targets):
    y = y.astype(jnp.float32)
    lse = jax.nn.logsumexp(y, axis=-1)
    tl = jnp.take_along_axis(y, targets[:, None], axis=-1)[:, 0]
    return jnp.mean(lse - tl)


def _ref_soft_ce(y, probs):
    y = y.astype(jnp.float32)
    lse = jax.nn.logsumexp(y, axis=-1, keepdims=True)
    return jnp.mean(jnp.sum(probs * (lse - y), axis=-1))


def _ref_err(y, targets):
    pred = jnp.argmax(y, axis=-1)
    return 1.0 - jnp.sum(pred == targets) / pred.shape[0]


if __name__ == "__main__":
    key = jax.random.PRNGKey(0)
    k1, k2, k3 = jax.random.split(key, 3)

    # Small, deliberately non-tile-aligned shapes; small tiles so the batch
    # grid, class grid and both padding masks are actually exercised.
    B, C = 200, 320
    tile_b, tile_c = 64, 256

    y = jax.random.normal(k1, (B, C), dtype=jnp.float32)
    targets = jax.random.randint(k2, (B,), 0, C, dtype=jnp.int32)
    soft_targets = jax.nn.softmax(
        jax.random.normal(k3, (B, C), dtype=jnp.float32), axis=-1)

    # training path, integer targets: hard-label cross-entropy
    ce = CatLoss(training=True, tile_b=tile_b, tile_c=tile_c)(y, targets)
    ce = jax.block_until_ready(ce)
    assert jnp.allclose(ce, _ref_hard_ce(y, targets), atol=1e-4, rtol=1e-4), ce

    # training/eval path, float [B, C] targets: soft-label cross-entropy
    sce = CatLoss(training=False, tile_b=tile_b, tile_c=tile_c)(y, soft_targets)
    sce = jax.block_until_ready(sce)
    assert jnp.allclose(sce, _ref_soft_ce(y, soft_targets),
                        atol=1e-4, rtol=1e-4), sce

    # eval path, integer targets: error rate (1 - accuracy)
    err = CatLoss(training=False, tile_b=tile_b, tile_c=tile_c)(y, targets)
    err = jax.block_until_ready(err)
    assert jnp.allclose(err, _ref_err(y, targets), atol=1e-6), err

    print("KERNEL_OK")
</pallas_src>

<mosaic_0001>
module attributes {stable_mosaic.version = 11 : i64} {
  func.func @_ce_hard_kernel(%arg0: i32, %arg1: i32, %arg2: memref<64x256xf32, #tpu.memory_space<vmem>>, %arg3: memref<64x1xi32, #tpu.memory_space<vmem>>, %arg4: memref<1x8x128xf32, #tpu.memory_space<vmem>>, %arg5: memref<64x1xf32, #tpu.memory_space<vmem>>, %arg6: memref<64x1xf32, #tpu.memory_space<vmem>>, %arg7: memref<64x1xf32, #tpu.memory_space<vmem>>) attributes {dimension_semantics = [#tpu.dimension_semantics<parallel>, #tpu.dimension_semantics<arbitrary>], iteration_bounds = array<i64: 4, 2>, scalar_prefetch = 0 : i64, scratch_operands = 3 : i64, tpu.core_type = #tpu.core_type<tc>, window_params = [{transform_indices = @transform_0, window_bounds = array<i64: 64, 256>}, {transform_indices = @transform_1, window_bounds = array<i64: 64, 1>}, {transform_indices = @transform_2, window_bounds = array<i64: 1, 8, 128>}]} {
    %c0_i32 = arith.constant 0 : i32
    %0 = arith.cmpi eq, %arg1, %c0_i32 : i32
    %1 = arith.extui %0 : i1 to i32
    %c0_i32_0 = arith.constant 0 : i32
    %2 = arith.cmpi ne, %1, %c0_i32_0 : i32
    scf.if %2 {
      %cst_23 = arith.constant 0xFF800000 : f32
      %42 = vector.broadcast %cst_23 : f32 to vector<64x1xf32>
      %c0_24 = arith.constant 0 : index
      %c0_25 = arith.constant 0 : index
      %43 = vector.load %arg5[%c0_24, %c0_25] : memref<64x1xf32, #tpu.memory_space<vmem>>, vector<64x1xf32>
      tpu.vector_store %arg5[%c0_24, %c0_25], %42 {strides = array<i32>} : memref<64x1xf32, #tpu.memory_space<vmem>>, vector<64x1xf32>,
      %cst_26 = arith.constant 0.000000e+00 : f32
      %44 = vector.broadcast %cst_26 : f32 to vector<64x1xf32>
      %c0_27 = arith.constant 0 : index
      %c0_28 = arith.constant 0 : index
      %45 = vector.load %arg6[%c0_27, %c0_28] : memref<64x1xf32, #tpu.memory_space<vmem>>, vector<64x1xf32>
      tpu.vector_store %arg6[%c0_27, %c0_28], %44 {strides = array<i32>} : memref<64x1xf32, #tpu.memory_space<vmem>>, vector<64x1xf32>,
      %cst_29 = arith.constant 0.000000e+00 : f32
      %46 = vector.broadcast %cst_29 : f32 to vector<64x1xf32>
      %c0_30 = arith.constant 0 : index
      %c0_31 = arith.constant 0 : index
      %47 = vector.load %arg7[%c0_30, %c0_31] : memref<64x1xf32, #tpu.memory_space<vmem>>, vector<64x1xf32>
      tpu.vector_store %arg7[%c0_30, %c0_31], %46 {strides = array<i32>} : memref<64x1xf32, #tpu.memory_space<vmem>>, vector<64x1xf32>,
    } else {
    }
    %3 = tpu.iota {dimensions = array<i32: 1>} : vector<64x256xi32>
    %c256_i32 = arith.constant 256 : i32
    %4 = arith.muli %arg1, %c256_i32 : i32
    %5 = vector.broadcast %4 : i32 to vector<64x256xi32>
    %6 = arith.addi %3, %5 : vector<64x256xi32>
    %c320_i32 = arith.constant 320 : i32
    %7 = vector.broadcast %c320_i32 : i32 to vector<64x256xi32>
    %8 = arith.cmpi slt, %6, %7 : vector<64x256xi32>
    %c0 = arith.constant 0 : index
    %c0_1 = arith.constant 0 : index
    %9 = vector.load %arg2[%c0, %c0_1] : memref<64x256xf32, #tpu.memory_space<vmem>>, vector<64x256xf32>
    %cst = arith.constant 0xFF800000 : f32
    %10 = vector.broadcast %cst : f32 to vector<64x256xf32>
    %11 = arith.select %8, %9, %10 : vector<64x256xi1>, vector<64x256xf32>
    %c0_2 = arith.constant 0 : index
    %c0_3 = arith.constant 0 : index
    %12 = vector.load %arg3[%c0_2, %c0_3] : memref<64x1xi32, #tpu.memory_space<vmem>>, vector<64x1xi32>
    %cst_4 = arith.constant dense<0xFF800000> : vector<64xf32>
    %13 = vector.multi_reduction <maximumf>, %11, %cst_4 [1] : vector<64x256xf32> to vector<64xf32>
    %14 = vector.shape_cast %13 : vector<64xf32> to vector<64x1xf32>
    %c0_5 = arith.constant 0 : index
    %c0_6 = arith.constant 0 : index
    %15 = vector.load %arg5[%c0_5, %c0_6] : memref<64x1xf32, #tpu.memory_space<vmem>>, vector<64x1xf32>
    %16 = arith.maximumf %15, %14 : vector<64x1xf32>
    %c0_7 = arith.constant 0 : index
    %c0_8 = arith.constant 0 : index
    %17 = vector.load %arg6[%c0_7, %c0_8] : memref<64x1xf32, #tpu.memory_space<vmem>>, vector<64x1xf32>
    %c0_9 = arith.constant 0 : index
    %c0_10 = arith.constant 0 : index
    %18 = vector.load %arg5[%c0_9, %c0_10] : memref<64x1xf32, #tpu.memory_space<vmem>>, vector<64x1xf32>
    %19 = arith.subf %18, %16 : vector<64x1xf32>
    %20 = math.exp %19 : vector<64x1xf32>
    %21 = arith.mulf %17, %20 : vector<64x1xf32>
    %22 = vector.broadcast %16 : vector<64x1xf32> to vector<64x256xf32>
    %23 = arith.subf %11, %22 : vector<64x256xf32>
    %24 = math.exp %23 : vector<64x256xf32>
    %cst_11 = arith.constant dense<0.000000e+00> : vector<64xf32>
    %25 = vector.multi_reduction <add>, %24, %cst_11 [1] : vector<64x256xf32> to vector<64xf32>
    %26 = vector.shape_cast %25 : vector<64xf32> to vector<64x1xf32>
    %27 = arith.addf %21, %26 : vector<64x1xf32>
    %c0_12 = arith.constant 0 : index
    %c0_13 = arith.constant 0 : index
    %28 = vector.load %arg6[%c0_12, %c0_13] : memref<64x1xf32, #tpu.memory_space<vmem>>, vector<64x1xf32>
    tpu.vector_store %arg6[%c0_12, %c0_13], %27 {strides = array<i32>} : memref<64x1xf32, #tpu.memory_space<vmem>>, vector<64x1xf32>,
    %c0_14 = arith.constant 0 : index
    %c0_15 = arith.constant 0 : index
    %29 = vector.load %arg7[%c0_14, %c0_15] : memref<64x1xf32, #tpu.memory_space<vmem>>, vector<64x1xf32>
    %30 = vector.broadcast %12 : vector<64x1xi32> to vector<64x256xi32>
    %31 = arith.cmpi eq, %6, %30 : vector<64x256xi32>
    %cst_16 = arith.constant 0.000000e+00 : f32
    %32 = vector.broadcast %cst_16 : f32 to vector<64x256xf32>
    %33 = arith.select %31, %11, %32 : vector<64x256xi1>, vector<64x256xf32>
    %cst_17 = arith.constant dense<0.000000e+00> : vector<64xf32>
    %34 = vector.multi_reduction <add>, %33, %cst_17 [1] : vector<64x256xf32> to vector<64xf32>
    %35 = vector.shape_cast %34 : vector<64xf32> to vector<64x1xf32>
    %36 = arith.addf %29, %35 : vector<64x1xf32>
    %c0_18 = arith.constant 0 : index
    %c0_19 = arith.constant 0 : index
    %37 = vector.load %arg7[%c0_18, %c0_19] : memref<64x1xf32, #tpu.memory_space<vmem>>, vector<64x1xf32>
    tpu.vector_store %arg7[%c0_18, %c0_19], %36 {strides = array<i32>} : memref<64x1xf32, #tpu.memory_space<vmem>>, vector<64x1xf32>,
    %c0_20 = arith.constant 0 : index
    %c0_21 = arith.constant 0 : index
    %38 = vector.load %arg5[%c0_20, %c0_21] : memref<64x1xf32, #tpu.memory_space<vmem>>, vector<64x1xf32>
    tpu.vector_store %arg5[%c0_20, %c0_21], %16 {strides = array<i32>} : memref<64x1xf32, #tpu.memory_space<vmem>>, vector<64x1xf32>,
    %c1_i32 = arith.constant 1 : i32
    %39 = arith.cmpi eq, %arg1, %c1_i32 : i32
    %40 = arith.extui %39 : i1 to i32
    %c0_i32_22 = arith.constant 0 : i32
    %41 = arith.cmpi ne, %40, %c0_i32_22 : i32
    scf.if %41 {
      %42 = tpu.iota {dimensions = array<i32: 0>} : vector<64x1xi32>
      %c64_i32 = arith.constant 64 : i32
      %43 = arith.muli %arg0, %c64_i32 : i32
      %44 = vector.broadcast %43 : i32 to vector<64x1xi32>
      %45 = arith.addi %42, %44 : vector<64x1xi32>
      %c0_23 = arith.constant 0 : index
      %c0_24 = arith.constant 0 : index
      %46 = vector.load %arg5[%c0_23, %c0_24] : memref<64x1xf32, #tpu.memory_space<vmem>>, vector<64x1xf32>
      %c0_25 = arith.constant 0 : index
      %c0_26 = arith.constant 0 : index
      %47 = vector.load %arg6[%c0_25, %c0_26] : memref<64x1xf32, #tpu.memory_space<vmem>>, vector<64x1xf32>
      %48 = math.log %47 : vector<64x1xf32>
      %49 = arith.addf %46, %48 : vector<64x1xf32>
      %c0_27 = arith.constant 0 : index
      %c0_28 = arith.constant 0 : index
      %50 = vector.load %arg7[%c0_27, %c0_28] : memref<64x1xf32, #tpu.memory_space<vmem>>, vector<64x1xf32>
      %51 = arith.subf %49, %50 : vector<64x1xf32>
      %c200_i32 = arith.constant 200 : i32
      %52 = vector.broadcast %c200_i32 : i32 to vector<64x1xi32>
      %53 = arith.cmpi slt, %45, %52 : vector<64x1xi32>
      %cst_29 = arith.constant 0.000000e+00 : f32
      %54 = vector.broadcast %cst_29 : f32 to vector<64x1xf32>
      %55 = arith.select %53, %51, %54 : vector<64x1xi1>, vector<64x1xf32>
      %56 = vector.shape_cast %55 : vector<64x1xf32> to vector<1x64x1xf32>
      %cst_30 = arith.constant dense<0.000000e+00> : vector<1xf32>
      %57 = vector.multi_reduction <add>, %56, %cst_30 [1, 2] : vector<1x64x1xf32> to vector<1xf32>
      %58 = vector.shape_cast %57 : vector<1xf32> to vector<1x1x1xf32>
      %59 = vector.extract %58[0, 0, 0] : f32 from vector<1x1x1xf32>
      %60 = vector.broadcast %59 : f32 to vector<1x1x1xf32>
      %61 = vector.shape_cast %60 : vector<1x1x1xf32> to vector<1x1x1xf32>
      %62 = vector.broadcast %61 : vector<1x1x1xf32> to vector<1x8x128xf32>
      %c0_31 = arith.constant 0 : index
      %c0_32 = arith.constant 0 : index
      %c0_33 = arith.constant 0 : index
      %63 = vector.load %arg4[%c0_31, %c0_32, %c0_33] : memref<1x8x128xf32, #tpu.memory_space<vmem>>, vector<1x8x128xf32>
      tpu.vector_store %arg4[%c0_31, %c0_32, %c0_33], %62 {strides = array<i32>} : memref<1x8x128xf32, #tpu.memory_space<vmem>>, vector<1x8x128xf32>,
    } else {
    }
    return
  }
  func.func @transform_0(%arg0: i32, %arg1: i32) -> (i32, i32) {
    %c0_i32 = arith.constant 0 : i32
    return %arg0, %arg1 : i32, i32
  }
  func.func @transform_1(%arg0: i32, %arg1: i32) -> (i32, i32) {
    %c0_i32 = arith.constant 0 : i32
    %c0_i32_0 = arith.constant 0 : i32
    return %arg0, %c0_i32 : i32, i32
  }
  func.func @transform_2(%arg0: i32, %arg1: i32) -> (i32, i32, i32) {
    %c0_i32 = arith.constant 0 : i32
    %c0_i32_0 = arith.constant 0 : i32
    %c0_i32_1 = arith.constant 0 : i32
    return %arg0, %c0_i32, %c0_i32_0 : i32, i32, i32
  }
}

</mosaic_0001>

<bundles_post_ra>
// kernel: tpu_custom_call.1
= control target key start
LH: loop header
LB: loop body
LE: loop exit
PB: predicated region body
PF: predicated region fallthrough
CT: control target
= control target key end

     0   :  { %7 = vsyncpa [#allocation6], 0  ;;  %s1814_s0 = inlined_call_operand.hbm [shape: f32[200,320], index: 0, kind: input, shape index: {}]   ;;  %s1815_s1 = inlined_call_operand.vmem [shape: s32[200,1], index: 1, kind: input, shape index: {}]   ;;  %s1816_s2 = inlined_call_operand.hbm [shape: f32[4,8,128], index: 2, kind: output, shape index: {}]  }
   0x1   :  { %9 = vsyncpa [#allocation6 + $0x1], 0 }
   0x2   :  { %10 = vsyncpa [#allocation7], 0 }
   0x3   :  { %12 = vsyncpa [#allocation7 + $0x1], 0  ;;  %s1241_s9 = smov 0   ;;  %s1243_s10 = smov 0  }
   0x4   :  { %s1245_s11 = smov 0   ;;  %s1247_s12 = smov 0  }
   0x5   :  { %s1249_s13 = smov 0   ;;  %s1251_s14 = smov 0  }
   0x6   :  { %s1253_s15 = smov 0   ;;  %s1255_s16 = smov 0  }
   0x7   :  { %s1257_s17 = smov 0   ;;  %s1259_s18 = smov 0  }
   0x8   :  { %s1261_s19 = smov 0  }
   0x9 LB: > { %1822 = sst [smem:[#allocation11_spill]] %s1197_s14  ;;  %s872_s20 = sadd.s32 4294967295, %s1217_s19   ;;  %s1217_s19 = sphi %s1261_s19, %s18_s19   ;;  %s1213_s18 = sphi %s1259_s18, %s1838_s18   ;;  %s1209_s17 = sphi %s1257_s17, %s1837_s17   ;;  %s1205_s16 = sphi %s1255_s16, %s1836_s16   ;;  %s1201_s15 = sphi %s1253_s15, %s1835_s15   ;;  %s1197_s14 = sphi %s1251_s14, %s1834_s14   ;;  %s1193_s13 = sphi %s1249_s13, %s1843_s13   ;;  %s1189_s12 = sphi %s1247_s12, %s1842_s12   ;;  %s1185_s11 = sphi %s1245_s11, %s1841_s11   ;;  %s1181_s10 = sphi %s1243_s10, %s1840_s10   ;;  %s1177_s9 = sphi %s1241_s9, %s1839_s9  }
   0xa   : > { %1823 = sst [smem:[#allocation12_spill]] %s1209_s17  ;;  %s873_s21 = sadd.s32 4294967294, %s1217_s19  }
   0xb   : > { %1824 = sst [smem:[#allocation13_spill]] %s1213_s18  ;;  %s27_s22 = sadd.s32 1, %s1209_s17 }
   0xc   : > { %s30_s23 = sadd.s32 1, %s1213_s18  ;;  %p28_p0 = scmp.ge.s32.totalorder %s27_s22, 2 }
   0xd   : > { %s39_s24 = sadd.s32 1, %s1197_s14  ;;  %p46_p1 = scmp.ne.s32.totalorder %s1197_s14, %s1193_s13 }
   0xe   : > { %p47_p2 = scmp.eq.s32.totalorder %s1217_s19, 0  ;;  %s1845_s22 = smov (%p28_p0, %s27_s22), 0 }
   0xf   : > { %1825 = sst [smem:[#allocation14_spill]] %s1845_s22  ;;  %s1847_s23 = smov (!%p28_p0, %s30_s23), %s1213_s18 }
  0x10   : > { %s35_s25 = ssub.s32 %s1209_s17, %s1845_s22  ;;  %p1307_p3 = por %p47_p2, %p46_p1 }
  0x11   : > { %p32_p4 = scmp.ge.s32.totalorder %s1847_s23, 4  ;;  %p52_p5 = scmp.ne.s32.totalorder %s1193_s13, %s1189_s12 }
  0x12   : > { %p53_p6 = scmp.eq.s32.totalorder %s872_s20, 0  ;;  %s91_s27 = sadd.s32 1, %s1185_s11 }
  0x13   : > { %s1849_s23 = smov (%p32_p4, %s1847_s23), 0  ;;  %p101_p8 = scmp.ne.s32.totalorder %s1185_s11, %s1181_s10 }
  0x14   : > { %1827 = sst [smem:[#allocation15_spill]] %s1849_s23  ;;  %p1315_p7 = por %p53_p6, %p52_p5 }
  0x15   : > { %s34_s29 = ssub.s32 %s1213_s18, %s1849_s23  ;;  %p102_p9 = scmp.eq.s32.totalorder %s872_s20, 7 }
  0x16   : > { %s36_s30 = sor.u32 %s35_s25, %s34_s29  ;;  %p89_p10 = scmp.eq.s32.totalorder %s34_s29, 0 }
  0x17   : > { %p37_p11 = scmp.eq.s32.totalorder %s36_s30, 0  ;;  %p1323_p12 = por %p102_p9, %p101_p8 }
  0x18   : > { %s1328_s4 = scalar_select %p89_p10, %s1185_s11, %s91_s27  }
  0x19   : > { %s1331_s5 = scalar_select %p37_p11, %s1197_s14, %s39_s24  }
  0x1a   : > { %p107_p13 = scmp.ne.s32.totalorder %s1181_s10, %s1177_s9  ;;  %p108_p0 = scmp.eq.s32.totalorder %s873_s21, 7 }
  0x1b   : > { %1830 = sst [smem:[#allocation16_spill]] %s1331_s5  ;;  %p875_p2 = scmp.ge.s32.totalorder %s1217_s19, 8 }
  0x1c   : > { %p1335_p1 = por %p108_p0, %p107_p13 }
  0x1d   : > { %124 = sbr.rel (%p875_p2) target bundleno = 75 (0x4b), region = 16 }
  0x1e   : > { %s1831_s6 = scalar_select %p1335_p1, 1, 0 }
  0x24   : > { %127 = sbr.rel (!%p1307_p3) target bundleno = 75 (0x4b), region = 20  ;;  %s128_s7 = sand.u32 (%p1307_p3), 1, %s1197_s14  }
  0x25   : > { %s877_s8 = sshll.u32 (%p1307_p3), %s1213_s18, 3  ;;  %s876_s12 = sshll.u32 (%p1307_p3), %s128_s7, 7 }
  0x26   : > { %s878_s20 = sshll.u32 (%p1307_p3), %s1209_s17, 1  ;;  %s135_s24 = ssub.s32 (%p1307_p3), 25, %s877_s8 }
  0x27   : > { %s139_s25 = ssub.s32 (%p1307_p3), 3, %s878_s20  ;;  %p136_p4 = scmp.lt.s32.totalorder (%p1307_p3), %s135_s24, 8 }
  0x28   : > { %p140_p5 = scmp.lt.s32.totalorder (%p1307_p3), %s139_s25, 2  ;;  %s1351_s29 = scalar_lea.sflag (%p1307_p3), [#allocation6], %s128_s7 }
  0x29   : > { %s132_s30 = scalar_lea.vmem (%p1307_p3), [#allocation5], %s876_s12 }
  0x2b   : > { %s1851_s24 = smov (!%p136_p4, %s135_s24), 8  ;;  %s1853_s25 = smov (!%p140_p5, %s139_s25), 2 }
  0x2c   : > { %s879_s21 = sshll.u32 %s1851_s24, 7 }
  0x2d   : > { %s1348_s27 = smul.u32 %s879_s21, %s1853_s25 }
  0x2f   : > { %s144_s26 = ssub.s32 2048, %s1348_s27 }
  0x30   : > { %145 = vsyncadd %s1351_s29, %s144_s26  ;;  %p880_p3 = scmp.ne.s32.totalorder %s1348_s27, 0  ;;  %s897_s8 = smul.u32 24, %s1213_s18 }
  0x31   : > { %s883_s23 = sshll.u32 %s1853_s25, 3  ;;  %s153_s22 = sshll.u32 %s132_s30, 4  ;;  %s1359_s22 = int_to_ptr.vmem [resolvable:$true] %s153_s22 }
  0x32   : > { %s148_s17 = sadd.s32 %s897_s8, %s878_s20  ;;  %s152_s21 = smul.u32 %s883_s23, %s1851_s24 }
  0x33   : > { %s882_s5 = sshll.u32 %s148_s17, 7  ;;  %s1071_s24 = scalar_lea.hbm %s1814_s0, 9600 }
  0x34   : > { %s1364_s12 = scalar_lea.hbm %s1814_s0, %s882_s5  ;;  %s1366_s26 = sshll.u32 %s152_s21, 4 }
  0x35   : > { %s1067_s18 = scalar_lea.hbm %s1364_s12, %s1366_s26  ;;  %p1072_p10 = scmp.lt.u32.totalorder %s1364_s12, %s1814_s0 }
  0x36   : > { %p1068_p6 = scmp.ne.s32.totalorder %s1364_s12, %s1067_s18  ;;  %p1073_p11 = scmp.lt.u32.totalorder %s1071_s24, %s1067_s18 }
  0x37   : > { %p1075_p0 = scmp.lt.u32.totalorder %s1067_s18, %s1364_s12 }
  0x38   : > { %p1069_p8 = pnand %p1068_p6, %p880_p3  ;;  %p1074_p13 = por %p1073_p11, %p1072_p10 }
  0x3a   : > { %p1070_p9 = pneg %p1069_p8  ;;  %p1076_p2 = por %p1075_p0, %p1074_p13 }
  0x3c   : > { %p1077_p4 = pnand %p1076_p2, %p1070_p9 }
  0x3e   : > { %1080 = shalt.err (!%p1077_p4)
}
  0x3f   : > { %s1081_s5 = scalar_lea.vmem %s1359_s22, %s1366_s26  ;;  %s1219_s8 = smov [#allocation5]  }
  0x40   : > { %p1082_p5 = scmp.ne.s32.totalorder %s1359_s22, %s1081_s5  ;;  %s1085_s21 = sshll.u32 %s1219_s8, 4  ;;  %s1086_s21 = int_to_ptr.vmem [resolvable:$false] %s1085_s21 }
  0x41   : > { %s1087_s7 = scalar_lea.vmem %s1086_s21, 4096  ;;  %p1088_p1 = scmp.lt.s32.totalorder %s1359_s22, %s1086_s21 }
  0x42   : > { %p1083_p6 = pnand %p1082_p5, %p880_p3  ;;  %p1089_p10 = scmp.lt.s32.totalorder %s1087_s7, %s1081_s5 }
  0x44   : > { %p1084_p8 = pneg %p1083_p6  ;;  %p1090_p11 = por %p1089_p10, %p1088_p1 }
  0x46   : > { %p1091_p13 = pnand %p1090_p11, %p1084_p8 }
  0x48   : > { %1094 = shalt.err (!%p1091_p13)
}
  0x49   : > { %s1220_s18 = smov 384   ;;  %s1221_s17 = smov 256  }
  0x4a   : > { %159 = dma.hbm_to_vmem [thread:$0]  (%p880_p3), %s1364_s12, %s1366_s26, %s1359_s22, %s1351_s29, %s1220_s18, %s1221_s17, %s883_s23  }
  0x4b PF: > { %p884_p9 = scmp.ge.s32.totalorder %s1217_s19, 1  ;;  %p178_p0 = scmp.lt.s32.totalorder %s1217_s19, 9 }
  0x4d   : > { %p179_p1 = pnand %p884_p9, %p178_p0 }
  0x4e   : > { %s184_s20 = sand.u32 (!%p179_p1), 1, %s1193_s13  }
  0x4f   : > { %182 = sbr.rel (%p179_p1) target bundleno = 852 (0x354), region = 28  ;;  %s885_s24 = sshll.u32 (!%p179_p1), %s184_s20, 7 }
  0x50   : > { %s185_s30 = scalar_lea.sflag (!%p179_p1), [#allocation6], %s184_s20  ;;  %s1398_s14 = scalar_lea.vmem (!%p179_p1), [#allocation5], %s885_s24 }
  0x56   : > { %1168 = dma.done.wait (%p1315_p7), %s185_s30, 2048  }
  0x57   : > { %1170 = vsyncadd (%p1315_p7), %s185_s30, 4294965248  ;;  %s215_s22 = sand.u32 1, %s1181_s10   ;;  %s887_s23 = sshll.u32 %s1205_s16, 3 }
  0x58   : > { %s1408_s25 = sshll.u32 %s215_s22, 3  ;;  %p233_p3 = scmp.lt.s32.totalorder %s887_s23, 24 }
  0x59   : > { %s217_s5 = scalar_lea.vmem [#allocation8], %s1408_s25  ;;  %p889_p7 = scmp.ne.s32.totalorder %s1201_s15, 0 }
  0x5a   : > { %s1855_s23 = smov (!%p233_p3, %s887_s23), 24  ;;  %vm246_vm0 = vcmask (!%p889_p7), 7168   ;;  %v1222_v0 = vmov (!%p889_p7), -inf   ;;  %v1223_v1 = vmov (!%p889_p7), 0.0  }
  0x5b   : > { %s888_s27 = sshll.u32 %s1855_s23, 3  ;;  %245 = sbr.rel (%p889_p7) target bundleno = 103 (0x67), region = 36  ;;  %247 = vst.msk [vmem:[#allocation2] sm:$0xff] (!%p889_p7), %vm246_vm0, %v1222_v0  ;;  %248 = vst.msk [vmem:[#allocation2 + $0x8] sm:$0xff] (!%p889_p7), %vm246_vm0, %v1222_v0 }
  0x5c   : > { %s1413_s26 = scalar_lea.vmem %s1815_s1, %s888_s27  ;;  %249 = vst.msk [vmem:[#allocation2 + $0x10] sm:$0xff] (!%p889_p7), %vm246_vm0, %v1222_v0  ;;  %250 = vst.msk [vmem:[#allocation2 + $0x18] sm:$0xff] (!%p889_p7), %vm246_vm0, %v1222_v0 }
  0x5d   : > { %251 = vst.msk [vmem:[#allocation2 + $0x20] sm:$0xff] (!%p889_p7), %vm246_vm0, %v1222_v0  ;;  %252 = vst.msk [vmem:[#allocation2 + $0x28] sm:$0xff] (!%p889_p7), %vm246_vm0, %v1222_v0 }
  0x5e   : > { %253 = vst.msk [vmem:[#allocation2 + $0x30] sm:$0xff] (!%p889_p7), %vm246_vm0, %v1222_v0  ;;  %254 = vst.msk [vmem:[#allocation2 + $0x38] sm:$0xff] (!%p889_p7), %vm246_vm0, %v1222_v0 }
  0x5f   : > { %255 = vst.msk [vmem:[#allocation3] sm:$0xff] (!%p889_p7), %vm246_vm0, %v1223_v1  ;;  %256 = vst.msk [vmem:[#allocation3 + $0x8] sm:$0xff] (!%p889_p7), %vm246_vm0, %v1223_v1 }
  0x60   : > { %257 = vst.msk [vmem:[#allocation3 + $0x10] sm:$0xff] (!%p889_p7), %vm246_vm0, %v1223_v1  ;;  %258 = vst.msk [vmem:[#allocation3 + $0x18] sm:$0xff] (!%p889_p7), %vm246_vm0, %v1223_v1 }
  0x61   : > { %259 = vst.msk [vmem:[#allocation3 + $0x20] sm:$0xff] (!%p889_p7), %vm246_vm0, %v1223_v1  ;;  %260 = vst.msk [vmem:[#allocation3 + $0x28] sm:$0xff] (!%p889_p7), %vm246_vm0, %v1223_v1 }
  0x62   : > { %261 = vst.msk [vmem:[#allocation3 + $0x30] sm:$0xff] %vm246_vm0, %v1223_v1  ;;  %262 = vst.msk [vmem:[#allocation3 + $0x38] sm:$0xff] %vm246_vm0, %v1223_v1 }
  0x63   : > { %263 = vst.msk [vmem:[#allocation4] sm:$0xff] %vm246_vm0, %v1223_v1  ;;  %264 = vst.msk [vmem:[#allocation4 + $0x8] sm:$0xff] %vm246_vm0, %v1223_v1 }
  0x64   : > { %265 = vst.msk [vmem:[#allocation4 + $0x10] sm:$0xff] %vm246_vm0, %v1223_v1  ;;  %266 = vst.msk [vmem:[#allocation4 + $0x18] sm:$0xff] %vm246_vm0, %v1223_v1 }
  0x65   : > { %267 = vst.msk [vmem:[#allocation4 + $0x20] sm:$0xff] %vm246_vm0, %v1223_v1  ;;  %268 = vst.msk [vmem:[#allocation4 + $0x28] sm:$0xff] %vm246_vm0, %v1223_v1 }
  0x66   : > { %269 = vst.msk [vmem:[#allocation4 + $0x30] sm:$0xff] %vm246_vm0, %v1223_v1  ;;  %270 = vst.msk [vmem:[#allocation4 + $0x38] sm:$0xff] %vm246_vm0, %v1223_v1 }
  0x67 PF: > { %v271_v2 = vlaneseq  ;;  %s890_s28 = sshll.u32 %s1201_s15, 8  ;;  %v280_v7 = vld [vmem:[%s1398_s14] sm:$0xff]  ;;  %v281_v9 = vld [vmem:[%s1398_s14 + $0x8] sm:$0xff]  ;;  %v282_v10 = vld [vmem:[%s1398_s14 + $0x10] sm:$0xff]  ;;  %v1224_v48 = vmov 0   ;;  %vm520_vm3 = vcmask 7168  }
  0x68   : > { %v275_v3 = vstv %s890_s28  ;;  %v284_v8 = vld [vmem:[%s1398_s14 + $0x20] sm:$0xff]  ;;  %v286_v11 = vld [vmem:[%s1398_s14 + $0x30] sm:$0xff]  ;;  %v283_v13 = vld [vmem:[%s1398_s14 + $0x18] sm:$0xff]  ;;  %1001 = vset.pattern.permute.xlu0 %v1224_v48  ;;  %1002 = vset.pattern.permute.xlu1 %v1224_v48  ;;  %p891_p2 = scmp.ne.s32.totalorder %s1201_s15, 1 }
  0x69   : > { %v272_v4 = vand.u32 127, %v271_v2  ;;  %v285_v14 = vld [vmem:[%s1398_s14 + $0x28] sm:$0xff]  ;;  %v287_v15 = vld [vmem:[%s1398_s14 + $0x38] sm:$0xff]  ;;  %v288_v24 = vld [vmem:[%s1398_s14 + $0x40] sm:$0xff]  ;;  %s892_s8 = sshll.u32 (!%p891_p2), %s1205_s16, 6 }
  0x6a   : > { %v289_v27 = vld [vmem:[%s1398_s14 + $0x48] sm:$0xff]  ;;  %v290_v28 = vld [vmem:[%s1398_s14 + $0x50] sm:$0xff]  ;;  %v291_v29 = vld [vmem:[%s1398_s14 + $0x58] sm:$0xff] }
  0x6b   : > { %v273_v5 = vadd.s32 128, %v272_v4  ;;  %v1443_v6 = vadd.s32 %v275_v3, %v272_v4  ;;  %v292_v36 = vld [vmem:[%s1398_s14 + $0x60] sm:$0xff]  ;;  %v293_v37 = vld [vmem:[%s1398_s14 + $0x68] sm:$0xff]  ;;  %v294_v38 = vld [vmem:[%s1398_s14 + $0x70] sm:$0xff] }
  0x6c   : > { %v295_v39 = vld [vmem:[%s1398_s14 + $0x78] sm:$0xff]  ;;  %v1545_v49 = vld [vmem:[#allocation2] sm:$0xff]  ;;  %v1547_v50 = vld [vmem:[#allocation2 + $0x10] sm:$0xff] }
  0x6d   : > { %v1450_v12 = vadd.s32 %v275_v3, %v273_v5  ;;  %vm278_vm1 = vcmp.lt.s32.totalorder %v1443_v6, 320  ;;  %v1555_v55 = vld [vmem:[#allocation2 + $0x8] sm:$0xff]  ;;  %v1557_v56 = vld [vmem:[#allocation2 + $0x18] sm:$0xff]  ;;  %v1575_v0 = vld [vmem:[#allocation2 + $0x20] sm:$0xff] }
  0x6e   : > { %v1458_v16 = vsel %vm278_vm1, %v280_v7, -inf  ;;  %v1462_v17 = vsel %vm278_vm1, %v284_v8, -inf  ;;  %v1467_v18 = vsel %vm278_vm1, %v282_v10, -inf  ;;  %v1471_v19 = vsel %vm278_vm1, %v286_v11, -inf  ;;  %v313_v60 = vld [vmem:[%s1413_s26 + $0x8] sm:$0xff]  ;;  %v315_v5 = vld [vmem:[%s1413_s26 + $0x18] sm:$0xff] }
  0x6f   : > { %vm279_vm2 = vcmp.lt.s32.totalorder %v1450_v12, 320  ;;  %v1503_v32 = vsel %vm278_vm1, %v288_v24, -inf  ;;  %v1511_v34 = vsel %vm278_vm1, %v290_v28, -inf  ;;  %v1527_v42 = vsel %vm278_vm1, %v292_v36, -inf  ;;  %v1577_v1 = vld [vmem:[#allocation2 + $0x28] sm:$0xff]  ;;  %v1595_v11 = vld [vmem:[#allocation2 + $0x30] sm:$0xff] }
  0x70   : > { %v1475_v20 = vsel %vm279_vm2, %v281_v9, -inf  ;;  %v1479_v21 = vsel %vm279_vm2, %v283_v13, -inf  ;;  %v1483_v22 = vsel %vm279_vm2, %v285_v14, -inf  ;;  %v1487_v23 = vsel %vm279_vm2, %v287_v15, -inf  ;;  %v1597_v13 = vld [vmem:[#allocation2 + $0x38] sm:$0xff]  ;;  %v317_v24 = vld [vmem:[%s1413_s26 + $0x28] sm:$0xff] }
  0x71   : > { %v320_v25 = vmax.f32 %v1458_v16, %v1475_v20  ;;  %v326_v26 = vmax.f32 %v1462_v17, %v1483_v22  ;;  %v323_v30 = vmax.f32 %v1467_v18, %v1479_v21  ;;  %v329_v31 = vmax.f32 %v1471_v19, %v1487_v23  ;;  %v312_v36 = vld [vmem:[%s1413_s26] sm:$0xff] }
  0x72   : > { %v1507_v33 = vsel %vm279_vm2, %v289_v27, -inf  ;;  %v1515_v35 = vsel %vm279_vm2, %v291_v29, -inf  ;;  %v1531_v43 = vsel %vm279_vm2, %v293_v37, -inf  ;;  %v1535_v44 = vsel %vm278_vm1, %v294_v38, -inf  ;;  %v314_v37 = vld [vmem:[%s1413_s26 + $0x10] sm:$0xff]  ;;  %v316_v38 = vld [vmem:[%s1413_s26 + $0x20] sm:$0xff] }
  0x73   : > { %321 = vmax.xlane.f32.xlu0 %v320_v25  ;;  %327 = vmax.xlane.f32.xlu1 %v326_v26  ;;  %v332_v40 = vmax.f32 %v1503_v32, %v1507_v33  ;;  %v335_v41 = vmax.f32 %v1511_v34, %v1515_v35  ;;  %v1539_v45 = vsel %vm279_vm2, %v295_v39, -inf  ;;  %v338_v46 = vmax.f32 %v1527_v42, %v1531_v43  ;;  %v318_v39 = vld [vmem:[%s1413_s26 + $0x30] sm:$0xff] }
  0x74   : > { %v341_v47 = vmax.f32 %v1535_v44, %v1539_v45 }
  0x77   : > { %324 = vmax.xlane.f32.xlu0 %v323_v30  ;;  %330 = vmax.xlane.f32.xlu1 %v329_v31  ;;  %v319_v31 = vld [vmem:[%s1413_s26 + $0x38] sm:$0xff] }
  0x7b   : > { %333 = vmax.xlane.f32.xlu0 %v332_v40  ;;  %336 = vmax.xlane.f32.xlu1 %v335_v41 }
  0x7f   : > { %339 = vmax.xlane.f32.xlu0 %v338_v46  ;;  %342 = vmax.xlane.f32.xlu1 %v341_v47 }
 0x100   : > { %v322_v51 = vpop.xlane.xlu0 %321  ;;  %v328_v52 = vpop.xlane.xlu1 %327 }
 0x101   : > { %v1550_v53 = vmax.f32 %v1545_v49, %v322_v51  ;;  %v1553_v54 = vmax.f32 %v1547_v50, %v328_v52 }
 0x103   : > { %v368_v57 = vsub.f32 %v1545_v49, %v1550_v53  ;;  %633 = vst.msk [vmem:[#allocation2] sm:$0xff] %vm520_vm3, %v1550_v53  ;;  %402 = vperm.xlu0 %1001, %v1550_v53   ;;  %v370_v58 = vsub.f32 %v1547_v50, %v1553_v54  ;;  %635 = vst.msk [vmem:[#allocation2 + $0x10] sm:$0xff] %vm520_vm3, %v1553_v54  ;;  %v360_v53 = vld [vmem:[#allocation3] sm:$0xff] }
 0x104   : > { %v325_v59 = vpop.xlane.xlu0 %324  ;;  %v331_v61 = vpop.xlane.xlu1 %330 }
 0x105   : > { %v1570_v62 = vmax.f32 %v1555_v55, %v325_v59  ;;  %v1573_v63 = vmax.f32 %v1557_v56, %v331_v61 }
 0x107   : > { %v369_v3 = vsub.f32 %v1555_v55, %v1570_v62  ;;  %634 = vst.msk [vmem:[#allocation2 + $0x8] sm:$0xff] %vm520_vm3, %v1570_v62  ;;  %541 = vperm.xlu0 %1001, %v313_v60   ;;  %407 = vperm.xlu1 %1002, %v1570_v62   ;;  %v371_v4 = vsub.f32 %v1557_v56, %v1573_v63  ;;  %636 = vst.msk [vmem:[#allocation2 + $0x18] sm:$0xff] %vm520_vm3, %v1573_v63 }
 0x108   : > { %v334_v7 = vpop.xlane.xlu0 %333  ;;  %v337_v8 = vpop.xlane.xlu1 %336 }
 0x109   : > { %v1590_v9 = vmax.f32 %v1575_v0, %v334_v7  ;;  %v1593_v10 = vmax.f32 %v1577_v1, %v337_v8 }
 0x10b   : > { %547 = vperm.xlu0 %1001, %v315_v5   ;;  %412 = vperm.xlu1 %1002, %v1553_v54   ;;  %v372_v14 = vsub.f32 %v1575_v0, %v1590_v9  ;;  %637 = vst.msk [vmem:[#allocation2 + $0x20] sm:$0xff] %vm520_vm3, %v1590_v9  ;;  %v373_v15 = vsub.f32 %v1577_v1, %v1593_v10  ;;  %638 = vst.msk [vmem:[#allocation2 + $0x28] sm:$0xff] %vm520_vm3, %v1593_v10  ;;  %v378_v1 = vmul.f32 1.442695, %v369_v3  ;;  %v531_v3 = vld [vmem:[#allocation4 + $0x10] sm:$0xff] }
 0x10c   : > { %v340_v25 = vpop.xlane.xlu0 %339  ;;  %v343_v26 = vpop.xlane.xlu1 %342 }
 0x10d   : > { %v1610_v27 = vmax.f32 %v1595_v11, %v340_v25  ;;  %v1613_v28 = vmax.f32 %v1597_v13, %v343_v26  ;;  %v384_v55 = vmul.f32 1.442695, %v372_v14  ;;  %v361_v14 = vld [vmem:[#allocation3 + $0x8] sm:$0xff] }
 0x10f   : > { %553 = vperm.xlu0 %1001, %v317_v24   ;;  %417 = vperm.xlu1 %1002, %v1573_v63   ;;  %v374_v29 = vsub.f32 %v1595_v11, %v1610_v27  ;;  %639 = vst.msk [vmem:[#allocation2 + $0x30] sm:$0xff] %vm520_vm3, %v1610_v27  ;;  %v375_v30 = vsub.f32 %v1597_v13, %v1613_v28  ;;  %640 = vst.msk [vmem:[#allocation2 + $0x38] sm:$0xff] %vm520_vm3, %v1613_v28  ;;  %v362_v11 = vld [vmem:[#allocation3 + $0x10] sm:$0xff] }
 0x113   : > { %422 = vperm.xlu1 %1002, %v1590_v9   ;;  %559 = vperm.xlu0 %1001, %v319_v31  }
 0x117   : > { %427 = vperm.xlu1 %1002, %v1593_v10  }
 0x11b   : > { %432 = vperm.xlu1 %1002, %v1610_v27  }
 0x11f   : > { %437 = vperm.xlu1 %1002, %v1613_v28  }
 0x123   : > { %538 = vperm.xlu1 %1002, %v312_v36  }
 0x127   : > { %544 = vperm.xlu1 %1002, %v314_v37  }
 0x12b   : > { %550 = vperm.xlu1 %1002, %v316_v38  }
 0x12f   : > { %556 = vperm.xlu1 %1002, %v318_v39  }
 0x182   : > { %v403_v40 = vpop.permute.xlu0 %402 }
 0x183   : > { %v440_v41 = vsub.f32 %v1458_v16, %v403_v40  ;;  %v441_v46 = vsub.f32 %v1475_v20, %v403_v40 }
 0x185   : > { %v456_v47 = vmul.f32 1.442695, %v440_v41  ;;  %v458_v48 = vmul.f32 1.442695, %v441_v46 }
 0x186   : > { %v408_v51 = vpop.permute.xlu1 %407  ;;  %v542_v52 = vpop.permute.xlu0 %541 }
 0x187   : > { %vm563_vm4 = vcmp.eq.s32.totalorder %v1443_v6, %v542_v52  ;;  %1003 = vpow2.f32 %v456_v47  ;;  %vm564_vm5 = vcmp.eq.s32.totalorder %v1450_v12, %v542_v52 }
 0x188   : > { %v579_v59 = vsel %vm563_vm4, %v1467_v18, 0.0  ;;  %1005 = vpow2.f32 %v458_v48  ;;  %v580_v60 = vsel %vm564_vm5, %v1479_v21, 0.0 }
 0x189   : > { %v596_v7 = vadd.f32 %v580_v60, %v579_v59 }
 0x18a   : > { %v413_v61 = vpop.permute.xlu1 %412  ;;  %v548_v5 = vpop.permute.xlu0 %547 }
 0x18b   : > { %vm567_vm6 = vcmp.eq.s32.totalorder %v1443_v6, %v548_v5  ;;  %vm568_vm7 = vcmp.eq.s32.totalorder %v1450_v12, %v548_v5  ;;  %597 = vadd.xlane.f32.xlu1 %v596_v7  ;;  %v442_v5 = vsub.f32 %v1467_v18, %v408_v51 }
 0x18c   : > { %v583_v8 = vsel %vm567_vm6, %v1471_v19, 0.0  ;;  %v584_v24 = vsel %vm568_vm7, %v1487_v23, 0.0 }
 0x18d   : > { %v602_v31 = vadd.f32 %v584_v24, %v583_v8  ;;  %v443_v24 = vsub.f32 %v1479_v21, %v408_v51 }
 0x18e   : > { %v418_v25 = vpop.permute.xlu1 %417  ;;  %v554_v26 = vpop.permute.xlu0 %553 }
 0x18f   : > { %v446_v36 = vsub.f32 %v1471_v19, %v418_v25  ;;  %v447_v37 = vsub.f32 %v1487_v23, %v418_v25  ;;  %vm571_vm8 = vcmp.eq.s32.totalorder %v1443_v6, %v554_v26  ;;  %vm572_vm9 = vcmp.eq.s32.totalorder %v1450_v12, %v554_v26  ;;  %603 = vadd.xlane.f32.xlu1 %v602_v31 }
 0x190   : > { %v587_v38 = vsel %vm571_vm8, %v1511_v34, 0.0  ;;  %v588_v41 = vsel %vm572_vm9, %v1515_v35, 0.0  ;;  %v460_v31 = vmul.f32 1.442695, %v442_v5 }
 0x191   : > { %v468_v39 = vmul.f32 1.442695, %v446_v36  ;;  %v470_v40 = vmul.f32 1.442695, %v447_v37  ;;  %v1004_v46 = vpop.eup %1003  ;;  %v608_v48 = vadd.f32 %v588_v41, %v587_v38  ;;  %v444_v36 = vsub.f32 %v1462_v17, %v413_v61 }
 0x192   : > { %v423_v47 = vpop.permute.xlu1 %422  ;;  %v1006_v52 = vpop.eup %1005  ;;  %v462_v38 = vmul.f32 1.442695, %v443_v24 }
 0x193   : > { %1007 = vpow2.f32 %v468_v39  ;;  %609 = vadd.xlane.f32.xlu1 %v608_v48  ;;  %v488_v23 = vadd.f32 %v1006_v52, %v1004_v46  ;;  %v464_v41 = vmul.f32 1.442695, %v444_v36  ;;  %v448_v48 = vsub.f32 %v1503_v32, %v423_v47 }
 0x194   : > { %1009 = vpow2.f32 %v470_v40 }
 0x196   : > { %v428_v19 = vpop.permute.xlu1 %427 }
 0x197   : > { %v450_v59 = vsub.f32 %v1511_v34, %v428_v19  ;;  %v451_v60 = vsub.f32 %v1515_v35, %v428_v19  ;;  %489 = vadd.xlane.f32.xlu1 %v488_v23  ;;  %v445_v34 = vsub.f32 %v1483_v22, %v413_v61  ;;  %v449_v61 = vsub.f32 %v1507_v33, %v423_v47 }
 0x199   : > { %v476_v7 = vmul.f32 1.442695, %v450_v59  ;;  %v478_v8 = vmul.f32 1.442695, %v451_v60  ;;  %v466_v46 = vmul.f32 1.442695, %v445_v34 }
 0x19a   : > { %v433_v25 = vpop.permute.xlu1 %432 }
 0x19b   : > { %1011 = vpow2.f32 %v476_v7  ;;  %v472_v7 = vmul.f32 1.442695, %v448_v48  ;;  %v452_v24 = vsub.f32 %v1527_v42, %v433_v25 }
 0x19c   : > { %1013 = vpow2.f32 %v478_v8 }
 0x19d   : > { %v1008_v26 = vpop.eup %1007  ;;  %1015 = vpow2.f32 %v460_v31 }
 0x19e   : > { %v1010_v37 = vpop.eup %1009  ;;  %v438_v39 = vpop.permute.xlu1 %437  ;;  %1017 = vpow2.f32 %v462_v38 }
 0x19f   : > { %v454_v35 = vsub.f32 %v1535_v44, %v438_v39  ;;  %v455_v18 = vsub.f32 %v1539_v45, %v438_v39  ;;  %v497_v40 = vadd.f32 %v1010_v37, %v1008_v26  ;;  %v474_v26 = vmul.f32 1.442695, %v449_v61  ;;  %v560_v37 = vpop.permute.xlu0 %559 }
 0x1a0   : > { %v480_v39 = vmul.f32 1.442695, %v452_v24  ;;  %vm575_vm0 = vcmp.eq.s32.totalorder %v1443_v6, %v560_v37  ;;  %vm576_vm1 = vcmp.eq.s32.totalorder %v1450_v12, %v560_v37  ;;  %v386_v37 = vmul.f32 1.442695, %v373_v15 }
 0x1a1   : > { %v484_v21 = vmul.f32 1.442695, %v454_v35  ;;  %v486_v51 = vmul.f32 1.442695, %v455_v18  ;;  %498 = vadd.xlane.f32.xlu1 %v497_v40  ;;  %v591_v48 = vsel %vm575_vm0, %v1535_v44, 0.0 }
 0x1a2   : > { %v539_v52 = vpop.permute.xlu1 %538 }
 0x1a3   : > { %1019 = vpow2.f32 %v484_v21  ;;  %vm561_vm10 = vcmp.eq.s32.totalorder %v1443_v6, %v539_v52  ;;  %vm562_vm11 = vcmp.eq.s32.totalorder %v1450_v12, %v539_v52  ;;  %v592_v52 = vsel %vm576_vm1, %v1539_v45, 0.0 }
 0x1a4   : > { %1021 = vpow2.f32 %v486_v51  ;;  %v577_v19 = vsel %vm561_vm10, %v1458_v16, 0.0  ;;  %v578_v23 = vsel %vm562_vm11, %v1475_v20, 0.0  ;;  %v453_v16 = vsub.f32 %v1531_v43, %v433_v25 }
 0x1a5   : > { %v1012_v59 = vpop.eup %1011  ;;  %1023 = vpow2.f32 %v464_v41  ;;  %v593_v60 = vadd.f32 %v578_v23, %v577_v19 }
 0x1a6   : > { %v1014_v5 = vpop.eup %1013  ;;  %1025 = vpow2.f32 %v466_v46  ;;  %v545_v8 = vpop.permute.xlu1 %544  ;;  %v482_v18 = vmul.f32 1.442695, %v453_v16 }
 0x1a7   : > { %vm565_vm12 = vcmp.eq.s32.totalorder %v1443_v6, %v545_v8  ;;  %vm566_vm13 = vcmp.eq.s32.totalorder %v1450_v12, %v545_v8  ;;  %594 = vadd.xlane.f32.xlu0 %v593_v60  ;;  %v503_v47 = vadd.f32 %v1014_v5, %v1012_v59  ;;  %v1016_v34 = vpop.eup %1015  ;;  %1027 = vpow2.f32 %v472_v7 }
 0x1a8   : > { %v581_v20 = vsel %vm565_vm12, %v1462_v17, 0.0  ;;  %v582_v31 = vsel %vm566_vm13, %v1483_v22, 0.0  ;;  %v1018_v35 = vpop.eup %1017  ;;  %1029 = vpow2.f32 %v474_v26  ;;  %v530_v26 = vld [vmem:[#allocation4 + $0x8] sm:$0xff] }
 0x1a9   : > { %504 = vadd.xlane.f32.xlu1 %v503_v47  ;;  %v599_v36 = vadd.f32 %v582_v31, %v581_v20  ;;  %1031 = vpow2.f32 %v480_v39  ;;  %v376_v47 = vmul.f32 1.442695, %v368_v57  ;;  %v534_v31 = vld [vmem:[#allocation4 + $0x28] sm:$0xff]  ;;  %v390_v39 = vmul.f32 1.442695, %v375_v30 }
 0x1aa   : > { %v551_v38 = vpop.permute.xlu1 %550  ;;  %1033 = vpow2.f32 %v482_v18 }
 0x1ab   : > { %vm569_vm14 = vcmp.eq.s32.totalorder %v1443_v6, %v551_v38  ;;  %vm570_vm15 = vcmp.eq.s32.totalorder %v1450_v12, %v551_v38  ;;  %600 = vadd.xlane.f32.xlu0 %v599_v36  ;;  %1035 = vpow2.f32 %v376_v47 }
 0x1ac   : > { %v585_v25 = vsel %vm569_vm14, %v1503_v32, 0.0  ;;  %v586_v17 = vsel %vm570_vm15, %v1507_v33, 0.0  ;;  %v491_v32 = vadd.f32 %v1018_v35, %v1016_v34  ;;  %v614_v33 = vadd.f32 %v592_v52, %v591_v48  ;;  %v363_v34 = vld [vmem:[#allocation3 + $0x18] sm:$0xff] }
 0x1ad   : > { %v1020_v22 = vpop.eup %1019  ;;  %v605_v40 = vadd.f32 %v586_v17, %v585_v25  ;;  %v380_v25 = vmul.f32 1.442695, %v370_v58  ;;  %v529_v17 = vld [vmem:[#allocation4] sm:$0xff]  ;;  %v388_v58 = vmul.f32 1.442695, %v374_v29 }
 0x1ae   : > { %v1022_v41 = vpop.eup %1021  ;;  %v557_v59 = vpop.permute.xlu1 %556 }
 0x1af   : > { %v1024_v21 = vpop.eup %1023  ;;  %606 = vadd.xlane.f32.xlu0 %v605_v40  ;;  %v509_v51 = vadd.f32 %v1022_v41, %v1020_v22  ;;  %vm573_vm2 = vcmp.eq.s32.totalorder %v1443_v6, %v557_v59  ;;  %vm574_vm4 = vcmp.eq.s32.totalorder %v1450_v12, %v557_v59  ;;  %v532_v6 = vld [vmem:[#allocation4 + $0x18] sm:$0xff]  ;;  %v382_v12 = vmul.f32 1.442695, %v371_v4  ;;  %v365_v22 = vld [vmem:[#allocation3 + $0x28] sm:$0xff] }
 0x1b0   : > { %v1026_v46 = vpop.eup %1025  ;;  %v589_v45 = vsel %vm573_vm2, %v1527_v42, 0.0  ;;  %v590_v8 = vsel %vm574_vm4, %v1531_v43, 0.0 }
 0x1b1   : > { %510 = vadd.xlane.f32.xlu1 %v509_v51  ;;  %v1028_v61 = vpop.eup %1027  ;;  %v494_v19 = vadd.f32 %v1026_v46, %v1024_v21  ;;  %v611_v24 = vadd.f32 %v590_v8, %v589_v45  ;;  %1037 = vpow2.f32 %v382_v12  ;;  %v533_v21 = vld [vmem:[#allocation4 + $0x20] sm:$0xff]  ;;  %v367_v51 = vld [vmem:[#allocation3 + $0x38] sm:$0xff] }
 0x1b2   : > { %v1030_v23 = vpop.eup %1029  ;;  %1039 = vpow2.f32 %v386_v37  ;;  %v646_v37 = vshrl.u32 (!%p891_p2), %v271_v2, 7 }
 0x1b3   : > { %492 = vadd.xlane.f32.xlu0 %v491_v32  ;;  %v1032_v60 = vpop.eup %1031  ;;  %v500_v5 = vadd.f32 %v1030_v23, %v1028_v61  ;;  %1041 = vpow2.f32 %v390_v39  ;;  %v536_v23 = vld [vmem:[#allocation4 + $0x38] sm:$0xff] }
 0x1b4   : > { %v1034_v7 = vpop.eup %1033  ;;  %1043 = vpow2.f32 %v378_v1  ;;  %v648_v39 = vadd.s32 (!%p891_p2), 16, %v646_v37  ;;  %v655_v1 = vstv (!%p891_p2), %s892_s8  ;;  %v653_v2 = vadd.s32 (!%p891_p2), 56, %v646_v37 }
 0x1b5   : > { %615 = vadd.xlane.f32.xlu1 %v614_v33  ;;  %v506_v44 = vadd.f32 %v1034_v7, %v1032_v60  ;;  %v1036_v36 = vpop.eup %1035  ;;  %1045 = vpow2.f32 %v380_v25  ;;  %v656_v25 = vadd.s32 (!%p891_p2), %v655_v1, %v646_v37 }
 0x1b6   : > { %v392_v56 = vmul.f32 %v1036_v36, %v360_v53  ;;  %1047 = vpow2.f32 %v384_v55 }
 0x1b7   : > { %495 = vadd.xlane.f32.xlu0 %v494_v19  ;;  %1049 = vpow2.f32 %v388_v58  ;;  %v1728_v58 = vadd.s32 (!%p891_p2), %v655_v1, %v653_v2  ;;  %vm720_vm5 = vcmp.lt.s32.totalorder (!%p891_p2), %v656_v25, 200 }
 0x1b9   : > { %vm727_vm12 = vcmp.lt.s32.totalorder (!%p891_p2), %v1728_v58, 200 }
 0x1bb   : > { %501 = vadd.xlane.f32.xlu0 %v500_v5  ;;  %v1038_v38 = vpop.eup %1037 }
 0x1bc   : > { %v395_v35 = vmul.f32 %v1038_v38, %v363_v34  ;;  %v1040_v18 = vpop.eup %1039  ;;  %v647_v34 = vadd.s32 (!%p891_p2), 8, %v646_v37 }
 0x1bd   : > { %v397_v30 = vmul.f32 %v1040_v18, %v365_v22  ;;  %v1042_v54 = vpop.eup %1041  ;;  %v652_v18 = vadd.s32 (!%p891_p2), 48, %v646_v37 }
 0x1be   : > { %v1044_v0 = vpop.eup %1043  ;;  %v399_v48 = vmul.f32 %v1042_v54, %v367_v51 }
 0x1bf   : > { %507 = vadd.xlane.f32.xlu0 %v506_v44  ;;  %v393_v33 = vmul.f32 %v1044_v0, %v361_v14  ;;  %v1046_v61 = vpop.eup %1045  ;;  %v364_v44 = vld [vmem:[#allocation3 + $0x20] sm:$0xff]  ;;  %v1726_v54 = vadd.s32 (!%p891_p2), %v655_v1, %v652_v18  ;;  %v667_v14 = vld [vmem:[#allocation2 + $0x18] sm:$0xff] (!%p891_p2) }
 0x1c0   : > { %v394_v60 = vmul.f32 %v1046_v61, %v362_v11  ;;  %v1048_v5 = vpop.eup %1047 }
 0x1c1   : > { %v396_v8 = vmul.f32 %v1048_v5, %v364_v44  ;;  %v670_v44 = vld [vmem:[#allocation2 + $0x30] sm:$0xff] (!%p891_p2)  ;;  %vm726_vm11 = vcmp.lt.s32.totalorder (!%p891_p2), %v1726_v54, 200 }
 0x1c3   : > { %612 = vadd.xlane.f32.xlu0 %v611_v24  ;;  %v1050_v24 = vpop.eup %1049 }
 0x218   : > { %v598_v16 = vpop.xlane.xlu1 %597 }
 0x219   : > { %v618_v20 = vadd.f32 %v598_v16, %v530_v26  ;;  %v366_v26 = vld [vmem:[#allocation3 + $0x30] sm:$0xff] }
 0x21b   : > { %626 = vst.msk [vmem:[#allocation4 + $0x8] sm:$0xff] %vm520_vm3, %v618_v20  ;;  %v398_v20 = vmul.f32 %v1050_v24, %v366_v26 }
 0x21c   : > { %v604_v42 = vpop.xlane.xlu1 %603 }
 0x21d   : > { %v620_v43 = vadd.f32 %v604_v42, %v532_v6  ;;  %v535_v42 = vld [vmem:[#allocation4 + $0x30] sm:$0xff] }
 0x21f   : > { %628 = vst.msk [vmem:[#allocation4 + $0x18] sm:$0xff] %vm520_vm3, %v620_v43 }
 0x220   : > { %v610_v49 = vpop.xlane.xlu1 %609 }
 0x221   : > { %v622_v57 = vadd.f32 %v610_v49, %v534_v31 }
 0x223   : > { %630 = vst.msk [vmem:[#allocation4 + $0x28] sm:$0xff] %vm520_vm3, %v622_v57 }
 0x224   : > { %v490_v63 = vpop.xlane.xlu1 %489 }
 0x225   : > { %v512_v4 = vadd.f32 %v490_v63, %v392_v56 }
 0x227   : > { %521 = vst.msk [vmem:[#allocation3] sm:$0xff] %vm520_vm3, %v512_v4 }
 0x22e   : > { %v499_v10 = vpop.xlane.xlu1 %498  ;;  %v672_v36 = vld [vmem:[#allocation3] sm:$0xff] (!%p891_p2) }
 0x22f   : > { %v515_v15 = vadd.f32 %v499_v10, %v395_v35  ;;  %1051 = vlog2.f32 (!%p891_p2), %v672_v36  ;;  %v649_v35 = vadd.s32 (!%p891_p2), 24, %v646_v37  ;;  %v650_v10 = vadd.s32 (!%p891_p2), 32, %v646_v37 }
 0x231   : > { %524 = vst.msk [vmem:[#allocation3 + $0x18] sm:$0xff] %vm520_vm3, %v515_v15  ;;  %v651_v15 = vadd.s32 (!%p891_p2), 40, %v646_v37 }
 0x234   : > { %v595_v13 = vpop.xlane.xlu0 %594 }
 0x235   : > { %v617_v28 = vadd.f32 %v595_v13, %v529_v17  ;;  %v657_v17 = vadd.s32 (!%p891_p2), %v655_v1, %v647_v34  ;;  %v658_v13 = vadd.s32 (!%p891_p2), %v655_v1, %v648_v39 }
 0x236   : > { %v505_v62 = vpop.xlane.xlu1 %504 }
 0x237   : > { %625 = vst.msk [vmem:[#allocation4] sm:$0xff] %vm520_vm3, %v617_v28  ;;  %v517_v40 = vadd.f32 %v505_v62, %v397_v30  ;;  %v659_v28 = vadd.s32 (!%p891_p2), %v655_v1, %v649_v35  ;;  %v664_v30 = vld [vmem:[#allocation2] sm:$0xff] (!%p891_p2)  ;;  %v660_v62 = vadd.s32 (!%p891_p2), %v655_v1, %v650_v10  ;;  %vm721_vm6 = vcmp.lt.s32.totalorder (!%p891_p2), %v657_v17, 200 }
 0x238   : > { %v601_v41 = vpop.xlane.xlu0 %600  ;;  %v675_v57 = vld [vmem:[#allocation3 + $0x18] sm:$0xff] (!%p891_p2)  ;;  %vm722_vm7 = vcmp.lt.s32.totalorder (!%p891_p2), %v658_v13, 200 }
 0x239   : > { %526 = vst.msk [vmem:[#allocation3 + $0x28] sm:$0xff] %vm520_vm3, %v517_v40  ;;  %v619_v50 = vadd.f32 %v601_v41, %v531_v3  ;;  %v1052_v22 = vpop.eup (!%p891_p2), %1051  ;;  %v665_v3 = vld [vmem:[#allocation2 + $0x8] sm:$0xff] (!%p891_p2)  ;;  %vm723_vm8 = vcmp.lt.s32.totalorder (!%p891_p2), %v659_v28, 200  ;;  %vm724_vm9 = vcmp.lt.s32.totalorder (!%p891_p2), %v660_v62, 200 }
 0x23a   : > { %v681_v40 = vmul.f32 (!%p891_p2), 0.6931472, %v1052_v22 }
 0x23b   : > { %627 = vst.msk [vmem:[#allocation4 + $0x10] sm:$0xff] %vm520_vm3, %v619_v50  ;;  %v1724_v50 = vadd.s32 (!%p891_p2), %v655_v1, %v651_v15 }
 0x23c   : > { %v607_v9 = vpop.xlane.xlu0 %606 }
 0x23d   : > { %v621_v46 = vadd.f32 %v607_v9, %v533_v21  ;;  %v666_v21 = vld [vmem:[#allocation2 + $0x10] sm:$0xff] (!%p891_p2)  ;;  %vm725_vm10 = vcmp.lt.s32.totalorder (!%p891_p2), %v1724_v50, 200 }
 0x23e   : > { %v511_v52 = vpop.xlane.xlu1 %510  ;;  %v704_v0 = vld [vmem:[#allocation4] sm:$0xff] (!%p891_p2) }
 0x23f   : > { %629 = vst.msk [vmem:[#allocation4 + $0x20] sm:$0xff] %vm520_vm3, %v621_v46  ;;  %v519_v32 = vadd.f32 %v511_v52, %v399_v48  ;;  %v696_v48 = vadd.f32 (!%p891_p2), %v681_v40, %v664_v30  ;;  %v705_v52 = vld [vmem:[#allocation4 + $0x8] sm:$0xff] (!%p891_p2) }
 0x240   : > { %v493_v19 = vpop.xlane.xlu0 %492  ;;  %v677_v63 = vld [vmem:[#allocation3 + $0x28] sm:$0xff] (!%p891_p2) }
 0x241   : > { %528 = vst.msk [vmem:[#allocation3 + $0x38] sm:$0xff] %vm520_vm3, %v519_v32  ;;  %v513_v27 = vadd.f32 %v493_v19, %v393_v33  ;;  %v668_v33 = vld [vmem:[#allocation2 + $0x20] sm:$0xff] (!%p891_p2)  ;;  %v712_v5 = vsub.f32 (!%p891_p2), %v696_v48, %v704_v0 }
 0x242   : > { %v616_v29 = vpop.xlane.xlu1 %615 }
 0x243   : > { %522 = vst.msk [vmem:[#allocation3 + $0x8] sm:$0xff] %vm520_vm3, %v513_v27  ;;  %v624_v59 = vadd.f32 %v616_v29, %v536_v23  ;;  %v706_v23 = vld [vmem:[#allocation4 + $0x10] sm:$0xff] (!%p891_p2)  ;;  %v669_v27 = vld [vmem:[#allocation2 + $0x28] sm:$0xff] (!%p891_p2) }
 0x244   : > { %v496_v7 = vpop.xlane.xlu0 %495 }
 0x245   : > { %632 = vst.msk [vmem:[#allocation4 + $0x38] sm:$0xff] %vm520_vm3, %v624_v59  ;;  %v514_v45 = vadd.f32 %v496_v7, %v394_v60  ;;  %v707_v60 = vld [vmem:[#allocation4 + $0x18] sm:$0xff] (!%p891_p2) }
 0x246   : > { %v708_v24 = vld [vmem:[#allocation4 + $0x20] sm:$0xff] (!%p891_p2) }
 0x247   : > { %523 = vst.msk [vmem:[#allocation3 + $0x10] sm:$0xff] %vm520_vm3, %v514_v45 }
 0x248   : > { %v502_v47 = vpop.xlane.xlu0 %501  ;;  %v679_v38 = vld [vmem:[#allocation3 + $0x38] sm:$0xff] (!%p891_p2) }
 0x249   : > { %v516_v16 = vadd.f32 %v502_v47, %v396_v8 }
 0x24a   : > { %v673_v49 = vld [vmem:[#allocation3 + $0x8] sm:$0xff] (!%p891_p2) }
 0x24b   : > { %525 = vst.msk [vmem:[#allocation3 + $0x20] sm:$0xff] %vm520_vm3, %v516_v16  ;;  %1053 = vlog2.f32 (!%p891_p2), %v673_v49  ;;  %v671_v16 = vld [vmem:[#allocation2 + $0x38] sm:$0xff] (!%p891_p2) }
 0x24c   : > { %v508_v6 = vpop.xlane.xlu0 %507  ;;  %v711_v34 = vld [vmem:[#allocation4 + $0x38] sm:$0xff] (!%p891_p2) }
 0x24d   : > { %v518_v12 = vadd.f32 %v508_v6, %v398_v20  ;;  %644 = sbr.rel (%p891_p2) target bundleno = 828 (0x33c), region = 40 }
 0x24e   : > { %v674_v53 = vld [vmem:[#allocation3 + $0x10] sm:$0xff] (!%p891_p2) }
 0x24f   : > { %527 = vst.msk [vmem:[#allocation3 + $0x30] sm:$0xff] %vm520_vm3, %v518_v12  ;;  %1055 = vlog2.f32 (!%p891_p2), %v674_v53  ;;  %v709_v12 = vld [vmem:[#allocation4 + $0x28] sm:$0xff] (!%p891_p2) }
 0x250   : > { %v613_v43 = vpop.xlane.xlu0 %612  ;;  %1057 = vlog2.f32 (!%p891_p2), %v675_v57 }
 0x251   : > { %v623_v31 = vadd.f32 %v613_v43, %v535_v42  ;;  %v728_v43 = vsel (!%p891_p2), %vm720_vm5, %v712_v5, 0.0 }
 0x252   : > { %v676_v56 = vld [vmem:[#allocation3 + $0x20] sm:$0xff] (!%p891_p2) }
 0x253   : > { %631 = vst.msk [vmem:[#allocation4 + $0x30] sm:$0xff] %vm520_vm3, %v623_v31  ;;  %1059 = vlog2.f32 (!%p891_p2), %v676_v56 }
 0x254   : > { %1061 = vlog2.f32 %v677_v63 }
 0x255   : > { %v1054_v55 = vpop.eup %1053 }
 0x256   : > { %v678_v4 = vld [vmem:[#allocation3 + $0x30] sm:$0xff]  ;;  %v683_v51 = vmul.f32 0.6931472, %v1054_v55 }
 0x257   : > { %1063 = vlog2.f32 %v678_v4  ;;  %v736_v4 = vsel %vm520_vm3, %v728_v43, 0.0 }
 0x258   : > { %1065 = vlog2.f32 %v679_v38  ;;  %v697_v19 = vadd.f32 %v683_v51, %v665_v3 }
 0x259   : > { %v1056_v41 = vpop.eup %1055 }
 0x25a   : > { %v1058_v9 = vpop.eup %1057  ;;  %v685_v46 = vmul.f32 0.6931472, %v1056_v41  ;;  %v713_v47 = vsub.f32 %v697_v19, %v705_v52  ;;  %v710_v49 = vld [vmem:[#allocation4 + $0x30] sm:$0xff] }
 0x25b   : > { %v687_v61 = vmul.f32 0.6931472, %v1058_v9 }
 0x25c   : > { %v698_v59 = vadd.f32 %v685_v46, %v666_v21  ;;  %v729_v57 = vsel %vm721_vm6, %v713_v47, 0.0 }
 0x25d   : > { %v1060_v32 = vpop.eup %1059  ;;  %v699_v8 = vadd.f32 %v687_v61, %v667_v14  ;;  %v737_v1 = vsel %vm520_vm3, %v729_v57, 0.0 }
 0x25e   : > { %v1062_v11 = vpop.eup %1061  ;;  %v689_v29 = vmul.f32 0.6931472, %v1060_v32  ;;  %v714_v42 = vsub.f32 %v698_v59, %v706_v23  ;;  %v738_v18 = vadd.f32 %v737_v1, %v736_v4 }
 0x25f   : > { %v691_v45 = vmul.f32 0.6931472, %v1062_v11  ;;  %v715_v53 = vsub.f32 %v699_v8, %v707_v60 }
 0x260   : > { %v700_v6 = vadd.f32 %v689_v29, %v668_v33  ;;  %v730_v63 = vsel %vm722_vm7, %v714_v42, 0.0 }
 0x261   : > { %v1064_v7 = vpop.eup %1063  ;;  %v701_v36 = vadd.f32 %v691_v45, %v669_v27  ;;  %v731_v35 = vsel %vm723_vm8, %v715_v53, 0.0  ;;  %v739_v2 = vsel %vm520_vm3, %v730_v63, 0.0 }
 0x262   : > { %v1066_v26 = vpop.eup %1065  ;;  %v693_v20 = vmul.f32 0.6931472, %v1064_v7  ;;  %v716_v56 = vsub.f32 %v700_v6, %v708_v24  ;;  %v741_v25 = vsel %vm520_vm3, %v731_v35, 0.0  ;;  %v740_v13 = vadd.f32 %v739_v2, %v738_v18 }
 0x263   : > { %v695_v31 = vmul.f32 0.6931472, %v1066_v26  ;;  %v717_v39 = vsub.f32 %v701_v36, %v709_v12 }
 0x264   : > { %v702_v37 = vadd.f32 %v693_v20, %v670_v44  ;;  %v732_v15 = vsel %vm724_vm9, %v716_v56, 0.0  ;;  %v742_v55 = vadd.f32 %v741_v25, %v740_v13 }
 0x265   : > { %v703_v38 = vadd.f32 %v695_v31, %v671_v16  ;;  %v733_v22 = vsel %vm725_vm10, %v717_v39, 0.0  ;;  %v743_v28 = vsel %vm520_vm3, %v732_v15, 0.0 }
 0x266   : > { %v718_v10 = vsub.f32 %v702_v37, %v710_v49  ;;  %v745_v62 = vsel %vm520_vm3, %v733_v22, 0.0  ;;  %v744_v40 = vadd.f32 %v743_v28, %v742_v55 }
 0x267   : > { %v719_v17 = vsub.f32 %v703_v38, %v711_v34 }
 0x268   : > { %v734_v30 = vsel %vm726_vm11, %v718_v10, 0.0  ;;  %v746_v54 = vadd.f32 %v745_v62, %v744_v40 }
 0x269   : > { %v735_v3 = vsel %vm727_vm12, %v719_v17, 0.0  ;;  %v747_v41 = vsel %vm520_vm3, %v734_v30, 0.0 }
 0x26a   : > { %v749_v21 = vsel %vm520_vm3, %v735_v3, 0.0  ;;  %v748_v51 = vadd.f32 %v747_v41, %v746_v54 }
 0x26c   : > { %v750_v50 = vadd.f32 %v749_v21, %v748_v51 }
 0x26e   : > { %751 = vadd.xlane.f32.xlu0 %v750_v50 }
 0x2fb   : > { %v752_v0 = vpop.xlane.xlu0 %751 }
 0x2fc   : > { %v753_v9 = vrot.slane %v752_v0, 4 }
 0x2fe   : > { %v754_v58 = vadd.f32 %v753_v9, %v752_v0 }
 0x300   : > { %v755_v14 = vrot.slane %v754_v58, 2 }
 0x302   : > { %v756_v46 = vadd.f32 %v755_v14, %v754_v58 }
 0x304   : > { %v757_v48 = vrot.slane %v756_v46, 1 }
 0x306   : > { %v758_v52 = vadd.f32 %v757_v48, %v756_v46 }
 0x308   : > { %898 = vpush %v758_v52 }
 0x339   : > { %s899_s15 = spop %898 }
 0x33a   : > { %v760_v32 = vstv %s899_s15 }
 0x33b   : > { %761 = vst [vmem:[%s217_s5] sm:$0xff] %v760_v32 }
 0x33c PF: > { %s894_s21 = sshll.u32 %s1205_s16, 7  ;;  %s776_s20 = sshll.u32 %s217_s5, 4  ;;  %s777_s20 = int_to_ptr.vmem [resolvable:$true] %s776_s20 }
 0x33d   : > { %s1754_s17 = scalar_lea.hbm %s1816_s2, %s894_s21  ;;  %s763_s24 = scalar_lea.sflag [#allocation7], %s215_s22 }
 0x33e   : > { %s1095_s30 = scalar_lea.vmem %s777_s20, 128  ;;  %s1225_s14 = smov [#allocation8]  }
 0x33f   : > { %p1096_p4 = scmp.ne.s32.totalorder %s777_s20, %s1095_s30  ;;  %s1099_s23 = sshll.u32 %s1225_s14, 4  ;;  %s1100_s23 = int_to_ptr.vmem [resolvable:$false] %s1099_s23 }
 0x340   : > { %s1101_s27 = scalar_lea.vmem %s1100_s23, 256  ;;  %p1102_p8 = scmp.lt.s32.totalorder %s777_s20, %s1100_s23 }
 0x341   : > { %p1097_p5 = pnand %p1096_p4, %p1323_p12  ;;  %p1103_p10 = scmp.lt.s32.totalorder %s1101_s27, %s1095_s30 }
 0x343   : > { %p1098_p6 = pneg %p1097_p5  ;;  %p1104_p11 = por %p1103_p10, %p1102_p8 }
 0x345   : > { %p1105_p13 = pnand %p1104_p11, %p1098_p6 }
 0x347   : > { %1108 = shalt.err (!%p1105_p13)
}
 0x348   : > { %s1109_s16 = scalar_lea.hbm %s1754_s17, 128  ;;  %s1113_s29 = scalar_lea.hbm %s1816_s2, 512 }
 0x349   : > { %p1110_p9 = scmp.ne.s32.totalorder %s1754_s17, %s1109_s16  ;;  %p1114_p3 = scmp.lt.u32.totalorder %s1754_s17, %s1816_s2 }
 0x34a   : > { %p1115_p7 = scmp.lt.u32.totalorder %s1113_s29, %s1109_s16  ;;  %p1117_p4 = scmp.lt.u32.totalorder %s1109_s16, %s1754_s17 }
 0x34b   : > { %p1111_p0 = pnand %p1110_p9, %p1323_p12 }
 0x34c   : > { %p1116_p2 = por %p1115_p7, %p1114_p3 }
 0x34d   : > { %p1112_p1 = pneg %p1111_p0 }
 0x34e   : > { %p1118_p5 = por %p1117_p4, %p1116_p2 }
 0x350   : > { %p1119_p6 = pnand %p1118_p5, %p1112_p1 }
 0x352   : > { %1122 = shalt.err (!%p1119_p6)
}
 0x353   : > { %901 = dma.vmem_to_hbm [thread:$0]  (%p1323_p12), %s777_s20, 128, %s1754_s17, %s763_s24  }
 0x354 PF: > { %p907_p8 = scmp.ge.s32.totalorder %s1217_s19, 2  ;;  %s788_s5 = sand.u32 1, %s1177_s9  }
 0x355   : > { %p1832_p10 = scmp.ne.s32.totalorder %s1831_s6, 0  ;;  %s789_s28 = scalar_lea.sflag [#allocation7], %s788_s5 }
 0x357   : > { %p904_p11 = pnand %p907_p8, %p1832_p10 }
 0x359   : > { %1172 = dma.done.wait (!%p904_p11), %s789_s28, 128  }
 0x35a   : > { %1174 = vsyncadd (!%p904_p11), %s789_s28, 4294967168  ;;  %s18_s19 = sadd.s32 1, %s1217_s19   ;;  %s1833_s3 = sld [smem:[#allocation11_spill]] }
 0x35b   : > { %p15_p13 = scmp.ge.s32.totalorder %s18_s19, 10   ;;  %s1834_s14 = sld [smem:[#allocation16_spill]] }
 0x35c   : > { %s1835_s15 = sld [smem:[#allocation12_spill]]  ;;  %s1836_s16 = sld [smem:[#allocation13_spill]] }
 0x35d   : > { %s1837_s17 = sld [smem:[#allocation14_spill]]  ;;  %s1838_s18 = sld [smem:[#allocation15_spill]] }
 0x35e   : > { %s1839_s9 = smov %s1181_s10  ;;  %s1840_s10 = smov %s1185_s11 }
 0x35f   : > { %s1841_s11 = smov %s1328_s4  ;;  %s1842_s12 = smov %s1193_s13 }
 0x360   : > { %s1843_s13 = smov %s1833_s3  ;;  %17 = sbr.rel (!%p15_p13) target bundleno = 9 (0x9), region = 84 }
 0x367   :  { %794 = vsyncpa [#allocation6], 1 }
 0x368   :  { %796 = vsyncpa [#allocation6 + $0x1], 1 }
 0x369   :  { %797 = vsyncpa [#allocation7], 1 }
 0x36a   :  { %799 = vsyncpa [#allocation7 + $0x1], 1 }

</bundles_post_ra>
